<compile_context>
chip_gen: v5e
topology: v5e:2x2
jax: 0.10.0
libtpu: 0.0.40
codegen_flags: <defaults>
</compile_context>

<pallas_src>
import jax
import jax.numpy as jnp
from jax import lax
from jax.experimental import pallas as pl
from jax.experimental.pallas import tpu as pltpu

# Problem sizes (consistent with the module: Conv2d(3 -> 64, kernel 4x4)).
N, C, H, W = 2, 3, 16, 16
KH, KW = 4, 4
OC = 64
OH, OW = H - KH + 1, W - KW + 1          # 13, 13 (stride 1, VALID padding)
K = C * KH * KW                           # 48  = contraction size
K_AUG = K + 1                             # 49  = contraction + bias row
KP = 56                                   # contraction padded to multiple of 8
M = OH * OW                               # 169 = spatial size per image
L = N * M                                 # 338 = fused lane extent (both images)
LP = 384                                  # lane extent padded to multiple of 128
MIN_VAL, MAX_VAL = -1.0, 1.0


def conv_hardtanh_kernel(p_ref, w_ref, o_ref):
    """Single grid step: fused conv-as-matmul + bias (folded) + hardtanh.

    p_ref: (KP, LP)  im2col patches for BOTH images + ones row, zero-padded
    w_ref: (OC, KP)  [conv weight | bias] rows, zero-padded along K
    o_ref: (OC, LP)  lane-dense output (unmasked full-width stores)
    """
    y = jnp.dot(w_ref[...], p_ref[...], preferred_element_type=jnp.float32)
    o_ref[...] = jnp.clip(y, MIN_VAL, MAX_VAL).astype(o_ref.dtype)


@jax.jit
def conv2d_hardtanh(x_nchw, w_oihw, b):
    """x_nchw: (N, C, H, W) f32; w_oihw: (OC, C, KH, KW); b: (OC,). Returns NCHW."""
    # Single-pass im2col directly from NCHW.  Feature order is (c, kh, kw),
    # matching w_oihw.reshape(OC, K) row-major order (verified by the
    # allclose assert against lax.conv below).
    patches = lax.conv_general_dilated_patches(
        x_nchw, filter_shape=(KH, KW), window_strides=(1, 1), padding="VALID",
        dimension_numbers=("NCHW", "OIHW", "NCHW"))       # (N, K, OH, OW)

    # Fused lane layout: (K, N*M) with n-major lane ordering, then fold bias
    # (ones row) and zero-pad to sublane/lane-aligned (KP, LP).
    p = jnp.transpose(patches.reshape(N, K, M), (1, 0, 2)).reshape(K, L)
    p = jnp.concatenate([p, jnp.ones((1, L), dtype=p.dtype)], axis=0)  # (49, 338)
    p = jnp.pad(p, ((0, KP - K_AUG), (0, LP - L)))                     # (56, 384)

    w_aug = jnp.concatenate([w_oihw.reshape(OC, K), b.reshape(OC, 1)], axis=1)
    w_aug = jnp.pad(w_aug, ((0, 0), (0, KP - K_AUG)))                  # (64, 56)

    out = pl.pallas_call(
        conv_hardtanh_kernel,
        out_shape=jax.ShapeDtypeStruct((OC, LP), jnp.float32),
        grid_spec=pltpu.PrefetchScalarGridSpec(
            num_scalar_prefetch=0,
            grid=(1,),                                     # single fused step
            in_specs=[
                pl.BlockSpec((KP, LP), lambda i: (0, 0)),  # patches (full block)
                pl.BlockSpec((OC, KP), lambda i: (0, 0)),  # weight+bias (full)
            ],
            out_specs=pl.BlockSpec((OC, LP), lambda i: (0, 0)),
        ),
        compiler_params=pltpu.CompilerParams(
            dimension_semantics=("arbitrary",)),
        cost_estimate=pl.CostEstimate(
            flops=2 * OC * K_AUG * L,
            transcendentals=0,
            bytes_accessed=4 * (KP * LP + OC * KP + OC * LP)),
    )(p, w_aug)

    # Drop padded lanes BEFORE reshaping (they hold clip(0)=0 junk), then
    # restore NCHW semantics of the original module.
    y = out[:, :L].reshape(OC, N, OH, OW)                  # n-major lane order
    return jnp.transpose(y, (1, 0, 2, 3))                  # (N, OC, OH, OW)


if __name__ == "__main__":
    key = jax.random.PRNGKey(0)
    kx, kw, kb = jax.random.split(key, 3)

    # Deterministic synthetic parameters (Conv2d(3 -> 64, kernel 4x4) + bias).
    x = jax.random.normal(kx, (N, C, H, W), dtype=jnp.float32)
    w_oihw = jax.random.normal(kw, (OC, C, KH, KW), dtype=jnp.float32) * 0.1
    b = jax.random.normal(kb, (OC,), dtype=jnp.float32) * 0.1

    out = conv2d_hardtanh(x, w_oihw, b)
    out = jax.block_until_ready(out)

    # Pure-JAX reference (conv + bias + hardtanh).
    ref = lax.conv_general_dilated(
        x, w_oihw, window_strides=(1, 1), padding="VALID",
        dimension_numbers=("NCHW", "OIHW", "NCHW"))
    ref = ref + b[None, :, None, None]
    ref = jnp.clip(ref, MIN_VAL, MAX_VAL)

    assert out.shape == (N, OC, OH, OW), out.shape
    assert jnp.allclose(out, ref, atol=1e-4, rtol=1e-4), "mismatch vs reference"
    print("KERNEL_OK")
</pallas_src>

<mosaic_0001>
module attributes {stable_mosaic.version = 11 : i64} {
  func.func @conv_hardtanh_kernel(%arg0: i32, %arg1: memref<56x384xf32, #tpu.memory_space<vmem>>, %arg2: memref<64x56xf32, #tpu.memory_space<vmem>>, %arg3: memref<64x384xf32, #tpu.memory_space<vmem>>) attributes {dimension_semantics = [#tpu.dimension_semantics<arbitrary>], iteration_bounds = array<i64: 1>, scalar_prefetch = 0 : i64, scratch_operands = 0 : i64, tpu.core_type = #tpu.core_type<tc>, window_params = [{pipeline_mode = #tpu.pipeline_mode<synchronous>, transform_indices = @transform_0, window_bounds = array<i64: 56, 384>}, {pipeline_mode = #tpu.pipeline_mode<synchronous>, transform_indices = @transform_1, window_bounds = array<i64: 64, 56>}, {pipeline_mode = #tpu.pipeline_mode<synchronous>, transform_indices = @transform_2, window_bounds = array<i64: 64, 384>}]} {
    %c0 = arith.constant 0 : index
    %c0_0 = arith.constant 0 : index
    %0 = vector.load %arg2[%c0, %c0_0] : memref<64x56xf32, #tpu.memory_space<vmem>>, vector<64x56xf32>
    %c0_1 = arith.constant 0 : index
    %c0_2 = arith.constant 0 : index
    %1 = vector.load %arg1[%c0_1, %c0_2] : memref<56x384xf32, #tpu.memory_space<vmem>>, vector<56x384xf32>
    %cst = arith.constant dense<0.000000e+00> : vector<64x384xf32>
    %2 = tpu.matmul %0, %1, %cst {dimension_numbers = #tpu.dot_dimension_numbers<[1], [0], [0], [1], [0, 0, 1, 1], [], []>} : vector<64x56xf32>, vector<56x384xf32>, vector<64x384xf32> -> vector<64x384xf32>
    %cst_3 = arith.constant -1.000000e+00 : f32
    %cst_4 = arith.constant 1.000000e+00 : f32
    %3 = vector.broadcast %cst_3 : f32 to vector<64x384xf32>
    %4 = arith.maximumf %3, %2 : vector<64x384xf32>
    %5 = vector.broadcast %cst_4 : f32 to vector<64x384xf32>
    %6 = arith.minimumf %5, %4 : vector<64x384xf32>
    %c0_5 = arith.constant 0 : index
    %c0_6 = arith.constant 0 : index
    %7 = vector.load %arg3[%c0_5, %c0_6] : memref<64x384xf32, #tpu.memory_space<vmem>>, vector<64x384xf32>
    tpu.vector_store %arg3[%c0_5, %c0_6], %6 {strides = array<i32>} : memref<64x384xf32, #tpu.memory_space<vmem>>, vector<64x384xf32>,
    return
  }
  func.func @transform_0(%arg0: i32) -> (i32, i32) {
    %c0_i32 = arith.constant 0 : i32
    %c0_i32_0 = arith.constant 0 : i32
    %c0_i32_1 = arith.constant 0 : i32
    return %c0_i32, %c0_i32_0 : i32, i32
  }
  func.func @transform_1(%arg0: i32) -> (i32, i32) {
    %c0_i32 = arith.constant 0 : i32
    %c0_i32_0 = arith.constant 0 : i32
    %c0_i32_1 = arith.constant 0 : i32
    return %c0_i32, %c0_i32_0 : i32, i32
  }
  func.func @transform_2(%arg0: i32) -> (i32, i32) {
    %c0_i32 = arith.constant 0 : i32
    %c0_i32_0 = arith.constant 0 : i32
    %c0_i32_1 = arith.constant 0 : i32
    return %c0_i32, %c0_i32_0 : i32, i32
  }
}

</mosaic_0001>

<bundles_post_ra>
// kernel: conv2d_hardtanh.1
= control target key start
LH: loop header
LB: loop body
LE: loop exit
PB: predicated region body
PF: predicated region fallthrough
CT: control target
= control target key end

     0   :  { %vm40_vm0 = vcmask 457728   ;;  %s547_s0 = inlined_call_operand.vmem [shape: f32[56,384], index: 0, kind: input, shape index: {}]   ;;  %s548_s1 = inlined_call_operand.vmem [shape: f32[64,56], index: 1, kind: input, shape index: {}]   ;;  %s549_s2 = inlined_call_operand.vmem [shape: f32[64,384], index: 2, kind: output, shape index: {}]  }
   0x1   :  { %v37_v0 = vld [vmem:[%s547_s0 + $0x90] sm:$0xff]  ;;  %v354_v1 = vld [vmem:[%s547_s0 + $0xa0] sm:$0xff]  ;;  %v34_v2 = vld [vmem:[%s547_s0 + $0x78] sm:$0xff] }
   0x2   :  { %312 = vmatpush.msra.mxu3 %v37_v0  ;;  %156 = vmatpush.msra.mxu2 %v354_v1  ;;  %v363_v3 = vld [vmem:[%s547_s0 + $0x88] sm:$0xff]  ;;  %v31_v4 = vld [vmem:[%s547_s0 + $0x60] sm:$0xff]  ;;  %v371_v5 = vld [vmem:[%s547_s0 + $0x70] sm:$0xff] }
   0x3   :  { %74 = vmatpush.msra.mxu0 %v37_v0  ;;  %v38_v6 = vld [vmem:[%s547_s0 + $0x98] sm:$0xff]  ;;  %v35_v7 = vld [vmem:[%s547_s0 + $0x80] sm:$0xff]  ;;  %v28_v8 = vld [vmem:[%s547_s0 + $0x48] sm:$0xff] }
   0x4   :  { %313 = vmatpush.msra.mxu3 %v34_v2  ;;  %157 = vmatpush.msra.mxu2 %v363_v3  ;;  %v386_v9 = vld [vmem:[%s547_s0 + $0x58] sm:$0xff]  ;;  %v32_v10 = vld [vmem:[%s547_s0 + $0x68] sm:$0xff]  ;;  %v25_v11 = vld [vmem:[%s547_s0 + $0x30] sm:$0xff] }
   0x5   :  { %115 = vmatpush.msra.mxu1 %v38_v6  ;;  %75 = vmatpush.msra.mxu0 %v34_v2  ;;  %v27_v12 = vld [vmem:[%s547_s0 + $0x40] sm:$0xff]  ;;  %v29_v13 = vld [vmem:[%s547_s0 + $0x50] sm:$0xff]  ;;  %v22_v14 = vld [vmem:[%s547_s0 + $0x18] sm:$0xff] }
   0x6   :  { %314 = vmatpush.msra.mxu3 %v31_v4  ;;  %158 = vmatpush.msra.mxu2 %v371_v5  ;;  %v24_v15 = vld [vmem:[%s547_s0 + $0x28] sm:$0xff]  ;;  %v26_v16 = vld [vmem:[%s547_s0 + $0x38] sm:$0xff]  ;;  %v19_v17 = vld [vmem:[%s547_s0] sm:$0xff] }
   0x7   :  { %116 = vmatpush.msra.mxu1 %v35_v7  ;;  %76 = vmatpush.msra.mxu0 %v31_v4  ;;  %v21_v18 = vld [vmem:[%s547_s0 + $0x10] sm:$0xff]  ;;  %v11_v20 = vld [vmem:[%s548_s1] sm:$0xff]  ;;  %v20_v22 = vld [vmem:[%s547_s0 + $0x8] sm:$0xff] }
   0x8   :  { %315 = vmatpush.msra.mxu3 %v28_v8  ;;  %159 = vmatpush.msra.mxu2 %v386_v9  ;;  %v17_v19 = vld [vmem:[%s548_s1 + $0x30] sm:$0xff]  ;;  %v23_v21 = vld [vmem:[%s547_s0 + $0x20] sm:$0xff]  ;;  %v18_v23 = vld [vmem:[%s548_s1 + $0x38] sm:$0xff] }
   0x9   :  { %117 = vmatpush.msra.mxu1 %v32_v10  ;;  %77 = vmatpush.msra.mxu0 %v28_v8  ;;  %v12_v24 = vld [vmem:[%s548_s1 + $0x8] sm:$0xff]  ;;  %v13_v25 = vld [vmem:[%s548_s1 + $0x10] sm:$0xff]  ;;  %v14_v26 = vld [vmem:[%s548_s1 + $0x18] sm:$0xff] }
   0xa   :  { %316 = vmatpush.msra.mxu3 %v25_v11  ;;  %160 = vmatpush.msra.mxu2 %v27_v12  ;;  %v15_v27 = vld [vmem:[%s548_s1 + $0x20] sm:$0xff]  ;;  %v16_v28 = vld [vmem:[%s548_s1 + $0x28] sm:$0xff] }
   0xb   :  { %118 = vmatpush.msra.mxu1 %v29_v13  ;;  %78 = vmatpush.msra.mxu0 %v25_v11 }
   0xc   :  { %317 = vmatpush.msra.mxu3 %v22_v14  ;;  %161 = vmatpush.msra.mxu2 %v24_v15 }
   0xd   :  { %119 = vmatpush.msra.mxu1 %v26_v16  ;;  %79 = vmatpush.msra.mxu0 %v22_v14 }
   0xe   :  { %318 = vmatpush.msra.mxu3 %v19_v17  ;;  %162 = vmatpush.msra.mxu2 %v21_v18 }
   0xf   :  { %270 = vmatmul.msk.f32.vlgmr.msra.gmra.mxu3 %vm40_vm0, %v17_v19  ;;  %280 = vmatmul.msk.f32.vlgmr.msra.gmra.mxu2 %vm40_vm0, %v11_v20 }
  0x10   :  { %319 = vmatpush.msrb.mxu3 %v38_v6  ;;  %120 = vmatpush.msra.mxu1 %v23_v21 }
  0x11   :  { %80 = vmatpush.msra.mxu0 %v19_v17 }
  0x12   :  { %320 = vmatpush.msrb.mxu3 %v35_v7  ;;  %121 = vmatpush.msra.mxu1 %v20_v22 }
  0x13   :  { %264 = vmatmul.msk.f32.vlgmr.msra.gmra.mxu0 %vm40_vm0, %v11_v20  ;;  %272 = vmatmul.msk.f32.vlgmr.msra.gmra.mxu1 %vm40_vm0, %v11_v20 }
  0x14   :  { %321 = vmatpush.msrb.mxu3 %v32_v10 }
  0x16   :  { %322 = vmatpush.msrb.mxu3 %v29_v13 }
  0x17   :  { %271 = vmatmul.msk.f32.gmra.mxu3 %vm40_vm0, %v18_v23  ;;  %281 = vmatmul.msk.f32.gmra.mxu2 %vm40_vm0, %v12_v24 }
  0x18   :  { %323 = vmatpush.msrb.mxu3 %v26_v16 }
  0x1a   :  { %324 = vmatpush.msrb.mxu3 %v23_v21 }
  0x1b   :  { %265 = vmatmul.msk.f32.gmra.mxu0 %vm40_vm0, %v12_v24  ;;  %273 = vmatmul.msk.f32.gmra.mxu1 %vm40_vm0, %v12_v24 }
  0x1c   :  { %325 = vmatpush.msrb.mxu3 %v20_v22 }
  0x1e   :  { %326 = vmatpush.msra.mxu3 %v354_v1 }
  0x1f   :  { %278 = vmatmul.msk.f32.vlgmr.msrb.gmra.mxu3 %vm40_vm0, %v17_v19  ;;  %282 = vmatmul.msk.f32.gmra.mxu2 %vm40_vm0, %v13_v25 }
  0x20   :  { %327 = vmatpush.msra.mxu3 %v363_v3 }
  0x22   :  { %328 = vmatpush.msra.mxu3 %v371_v5 }
  0x23   :  { %266 = vmatmul.msk.f32.gmra.mxu0 %vm40_vm0, %v13_v25  ;;  %274 = vmatmul.msk.f32.gmra.mxu1 %vm40_vm0, %v13_v25 }
  0x24   :  { %329 = vmatpush.msra.mxu3 %v386_v9 }
  0x26   :  { %330 = vmatpush.msra.mxu3 %v27_v12 }
  0x27   :  { %279 = vmatmul.msk.f32.gmra.mxu3 %vm40_vm0, %v18_v23  ;;  %283 = vmatmul.msk.f32.gmra.mxu2 %vm40_vm0, %v14_v26 }
  0x28   :  { %331 = vmatpush.msra.mxu3 %v24_v15 }
  0x2a   :  { %332 = vmatpush.msra.mxu3 %v21_v18 }
  0x2b   :  { %267 = vmatmul.msk.f32.gmra.mxu0 %vm40_vm0, %v14_v26  ;;  %275 = vmatmul.msk.f32.gmra.mxu1 %vm40_vm0, %v14_v26 }
  0x2f   :  { %284 = vmatmul.msk.f32.gmra.mxu2 %vm40_vm0, %v15_v27  ;;  %286 = vmatmul.msk.f32.vlgmr.msra.gmra.mxu3 %vm40_vm0, %v17_v19 }
  0x33   :  { %268 = vmatmul.msk.f32.gmra.mxu0 %vm40_vm0, %v15_v27  ;;  %276 = vmatmul.msk.f32.gmra.mxu1 %vm40_vm0, %v15_v27 }
  0x37   :  { %285 = vmatmul.msk.f32.gmra.mxu2 %vm40_vm0, %v16_v28  ;;  %287 = vmatmul.msk.f32.gmra.mxu3 %vm40_vm0, %v18_v23 }
  0x3b   :  { %269 = vmatmul.msk.f32.gmra.mxu0 %vm40_vm0, %v16_v28  ;;  %277 = vmatmul.msk.f32.gmra.mxu1 %vm40_vm0, %v16_v28 }
  0x90   :  { %v82_v29 = vpop.f32.mrf.mxu0  ;;  %v123_v30 = vpop.f32.mrf.mxu1 }
  0x91   :  { %v288_v31 = vclamps-f32 %v82_v29, 1.0  ;;  %v289_v32 = vclamps-f32 %v123_v30, 1.0 }
  0x92   :  { %v100_v33 = vpop.f32.mrf.mxu3  ;;  %v164_v34 = vpop.f32.mrf.mxu2 }
  0x93   :  { %236 = vst [vmem:[%s549_s2] sm:$0xff] %v288_v31  ;;  %v306_v35 = vclamps-f32 %v100_v33, 1.0  ;;  %v290_v36 = vclamps-f32 %v164_v34, 1.0 }
  0x94   :  { %237 = vst [vmem:[%s549_s2 + $0x8] sm:$0xff] %v289_v32 }
  0x95   :  { %254 = vst [vmem:[%s549_s2 + $0x90] sm:$0xff] %v306_v35 }
  0x96   :  { %238 = vst [vmem:[%s549_s2 + $0x10] sm:$0xff] %v290_v36 }
  0x98   :  { %v85_v37 = vpop.f32.mrf.mxu0  ;;  %v126_v38 = vpop.f32.mrf.mxu1 }
  0x99   :  { %v291_v39 = vclamps-f32 %v85_v37, 1.0  ;;  %v292_v40 = vclamps-f32 %v126_v38, 1.0 }
  0x9a   :  { %v103_v41 = vpop.f32.mrf.mxu3  ;;  %v167_v42 = vpop.f32.mrf.mxu2 }
  0x9b   :  { %239 = vst [vmem:[%s549_s2 + $0x18] sm:$0xff] %v291_v39  ;;  %v309_v43 = vclamps-f32 %v103_v41, 1.0  ;;  %v293_v44 = vclamps-f32 %v167_v42, 1.0 }
  0x9c   :  { %240 = vst [vmem:[%s549_s2 + $0x20] sm:$0xff] %v292_v40 }
  0x9d   :  { %257 = vst [vmem:[%s549_s2 + $0xa8] sm:$0xff] %v309_v43 }
  0x9e   :  { %241 = vst [vmem:[%s549_s2 + $0x28] sm:$0xff] %v293_v44 }
  0xa0   :  { %v88_v45 = vpop.f32.mrf.mxu0  ;;  %v129_v46 = vpop.f32.mrf.mxu1 }
  0xa1   :  { %v294_v47 = vclamps-f32 %v88_v45, 1.0  ;;  %v295_v48 = vclamps-f32 %v129_v46, 1.0 }
  0xa2   :  { %v141_v49 = vpop.f32.mrf.mxu3  ;;  %v170_v50 = vpop.f32.mrf.mxu2 }
  0xa3   :  { %242 = vst [vmem:[%s549_s2 + $0x30] sm:$0xff] %v294_v47  ;;  %v307_v51 = vclamps-f32 %v141_v49, 1.0  ;;  %v296_v52 = vclamps-f32 %v170_v50, 1.0 }
  0xa4   :  { %243 = vst [vmem:[%s549_s2 + $0x38] sm:$0xff] %v295_v48 }
  0xa5   :  { %255 = vst [vmem:[%s549_s2 + $0x98] sm:$0xff] %v307_v51 }
  0xa6   :  { %244 = vst [vmem:[%s549_s2 + $0x40] sm:$0xff] %v296_v52 }
  0xa8   :  { %v91_v53 = vpop.f32.mrf.mxu0  ;;  %v132_v54 = vpop.f32.mrf.mxu1 }
  0xa9   :  { %v297_v55 = vclamps-f32 %v91_v53, 1.0  ;;  %v298_v56 = vclamps-f32 %v132_v54, 1.0 }
  0xaa   :  { %v144_v57 = vpop.f32.mrf.mxu3  ;;  %v173_v58 = vpop.f32.mrf.mxu2 }
  0xab   :  { %245 = vst [vmem:[%s549_s2 + $0x48] sm:$0xff] %v297_v55  ;;  %v310_v59 = vclamps-f32 %v144_v57, 1.0  ;;  %v299_v60 = vclamps-f32 %v173_v58, 1.0 }
  0xac   :  { %246 = vst [vmem:[%s549_s2 + $0x50] sm:$0xff] %v298_v56 }
  0xad   :  { %258 = vst [vmem:[%s549_s2 + $0xb0] sm:$0xff] %v310_v59 }
  0xae   :  { %247 = vst [vmem:[%s549_s2 + $0x58] sm:$0xff] %v299_v60 }
  0xb0   :  { %v94_v61 = vpop.f32.mrf.mxu0  ;;  %v135_v62 = vpop.f32.mrf.mxu1 }
  0xb1   :  { %v300_v63 = vclamps-f32 %v94_v61, 1.0  ;;  %v301_v0 = vclamps-f32 %v135_v62, 1.0 }
  0xb2   :  { %v176_v1 = vpop.f32.mrf.mxu2  ;;  %v182_v2 = vpop.f32.mrf.mxu3 }
  0xb3   :  { %248 = vst [vmem:[%s549_s2 + $0x60] sm:$0xff] %v300_v63  ;;  %v302_v3 = vclamps-f32 %v176_v1, 1.0  ;;  %v308_v4 = vclamps-f32 %v182_v2, 1.0 }
  0xb4   :  { %249 = vst [vmem:[%s549_s2 + $0x68] sm:$0xff] %v301_v0 }
  0xb5   :  { %250 = vst [vmem:[%s549_s2 + $0x70] sm:$0xff] %v302_v3 }
  0xb6   :  { %256 = vst [vmem:[%s549_s2 + $0xa0] sm:$0xff] %v308_v4 }
  0xb8   :  { %v97_v5 = vpop.f32.mrf.mxu0  ;;  %v138_v6 = vpop.f32.mrf.mxu1 }
  0xb9   :  { %v303_v7 = vclamps-f32 %v97_v5, 1.0  ;;  %v304_v8 = vclamps-f32 %v138_v6, 1.0 }
  0xba   :  { %v179_v9 = vpop.f32.mrf.mxu2  ;;  %v185_v10 = vpop.f32.mrf.mxu3 }
  0xbb   :  { %251 = vst [vmem:[%s549_s2 + $0x78] sm:$0xff] %v303_v7  ;;  %v305_v11 = vclamps-f32 %v179_v9, 1.0  ;;  %v311_v12 = vclamps-f32 %v185_v10, 1.0 }
  0xbc   :  { %252 = vst [vmem:[%s549_s2 + $0x80] sm:$0xff] %v304_v8 }
  0xbd   :  { %253 = vst [vmem:[%s549_s2 + $0x88] sm:$0xff] %v305_v11 }
  0xbe   :  { %259 = vst [vmem:[%s549_s2 + $0xb8] sm:$0xff] %v311_v12 }

</bundles_post_ra>
